<compile_context>
chip_gen: v6e
topology: v6e:2x2x1
jax: 0.10.0
libtpu: 0.0.40
codegen_flags: <defaults>
</compile_context>

<pallas_src>
import jax
import jax.numpy as jnp
from jax.experimental import pallas as pl
from jax.experimental.pallas import tpu as pltpu


def _linear_t_kernel(x_ref, wb_ref, out_ref):
    # x_ref   : (D_in, S)        -- x1[0] in its original torch layout
    # wb_ref  : (D_out, D_in+1)  -- [weight | bias] packed (bias = last column)
    # out_ref : (D_out, S)       -- W @ x + bias[:, None]
    d_out, s = out_ref.shape
    d_in = x_ref.shape[0]

    x = x_ref[...].astype(jnp.float32)       # one vreg at this size
    wb = wb_ref[...].astype(jnp.float32)

    # Start from the bias column broadcast over lanes.
    acc = jnp.broadcast_to(wb[:, d_in:d_in + 1], (d_out, s))
    # K = D_in (=2) contraction as VPU broadcast-FMAs; no MXU, no MRF drain.
    for k in range(d_in):
        wk = jnp.broadcast_to(wb[:, k:k + 1], (d_out, s))
        xk = jnp.broadcast_to(x[k:k + 1, :], (d_out, s))
        acc = acc + wk * xk

    out_ref[...] = acc.astype(out_ref.dtype)


def model_forward(x1, weight, bias):
    """Replicates Model.forward(x1) for B == 1 (as in the torch spec)."""
    B, D_in, S = x1.shape
    D_out = weight.shape[0]
    assert B == 1, "kernel folds the batch dim; the torch spec uses B == 1"

    # Pack weight + bias into one operand -> 2 input DMAs instead of 3.
    wb = jnp.concatenate([weight, bias.reshape(D_out, 1)], axis=1)
    # Squeeze the size-1 batch dim on the wrapper side (free layout work).
    x2d = x1.reshape(D_in, S)

    vmem = pl.BlockSpec(memory_space=pltpu.MemorySpace.VMEM)
    out2d = pl.pallas_call(
        _linear_t_kernel,
        out_shape=jax.ShapeDtypeStruct((D_out, S), x1.dtype),
        in_specs=[vmem, vmem],
        out_specs=vmem,
    )(x2d, wb)
    return out2d.reshape(B, D_out, S)


def reference_forward(x1, weight, bias):
    v1 = jnp.transpose(x1, (0, 2, 1))
    v2 = jnp.einsum("bsi,oi->bso", v1, weight) + bias[None, None, :]
    return jnp.swapaxes(v2, -1, -2)


if __name__ == "__main__":
    key = jax.random.PRNGKey(0)
    kx, kw, kb = jax.random.split(key, 3)

    # x1 ~ torch.randn(1, 2, 2)
    x1 = jax.random.normal(kx, (1, 2, 2), dtype=jnp.float32)

    # nn.Linear(2, 2): weight (2, 2), bias (2,), deterministic init.
    weight = jax.random.uniform(kw, (2, 2), dtype=jnp.float32,
                                minval=-0.5, maxval=0.5)
    bias = jax.random.uniform(kb, (2,), dtype=jnp.float32,
                              minval=-0.5, maxval=0.5)

    out = jax.block_until_ready(model_forward(x1, weight, bias))
    ref = reference_forward(x1, weight, bias)

    assert out.shape == (1, 2, 2)
    assert jnp.allclose(out, ref, atol=1e-5, rtol=1e-5)
    print("KERNEL_OK")
</pallas_src>

<mosaic_0001>
module attributes {stable_mosaic.version = 11 : i64} {
  func.func @_linear_t_kernel(%arg0: memref<2x2xf32, #tpu.memory_space<vmem>>, %arg1: memref<2x3xf32, #tpu.memory_space<vmem>>, %arg2: memref<2x2xf32, #tpu.memory_space<vmem>>) attributes {dimension_semantics = [], scalar_prefetch = 0 : i64, scratch_operands = 0 : i64, tpu.core_type = #tpu.core_type<tc>} {
    %c0 = arith.constant 0 : index
    %c0_0 = arith.constant 0 : index
    %0 = vector.load %arg0[%c0, %c0_0] : memref<2x2xf32, #tpu.memory_space<vmem>>, vector<2x2xf32>
    %c0_1 = arith.constant 0 : index
    %c0_2 = arith.constant 0 : index
    %1 = vector.load %arg1[%c0_1, %c0_2] : memref<2x3xf32, #tpu.memory_space<vmem>>, vector<2x3xf32>
    %2 = vector.extract_strided_slice %1 {offsets = [0, 2], sizes = [2, 1], strides = [1, 1]} : vector<2x3xf32> to vector<2x1xf32>
    %3 = vector.shape_cast %2 : vector<2x1xf32> to vector<2x1xf32>
    %4 = vector.broadcast %3 : vector<2x1xf32> to vector<2x2xf32>
    %5 = vector.extract_strided_slice %1 {offsets = [0, 0], sizes = [2, 1], strides = [1, 1]} : vector<2x3xf32> to vector<2x1xf32>
    %6 = vector.shape_cast %5 : vector<2x1xf32> to vector<2x1xf32>
    %7 = vector.broadcast %6 : vector<2x1xf32> to vector<2x2xf32>
    %8 = vector.extract_strided_slice %0 {offsets = [0, 0], sizes = [1, 2], strides = [1, 1]} : vector<2x2xf32> to vector<1x2xf32>
    %9 = vector.shape_cast %8 : vector<1x2xf32> to vector<1x2xf32>
    %10 = vector.broadcast %9 : vector<1x2xf32> to vector<2x2xf32>
    %11 = arith.mulf %7, %10 : vector<2x2xf32>
    %12 = arith.addf %4, %11 : vector<2x2xf32>
    %13 = vector.extract_strided_slice %1 {offsets = [0, 1], sizes = [2, 1], strides = [1, 1]} : vector<2x3xf32> to vector<2x1xf32>
    %14 = vector.shape_cast %13 : vector<2x1xf32> to vector<2x1xf32>
    %15 = vector.broadcast %14 : vector<2x1xf32> to vector<2x2xf32>
    %16 = vector.extract_strided_slice %0 {offsets = [1, 0], sizes = [1, 2], strides = [1, 1]} : vector<2x2xf32> to vector<1x2xf32>
    %17 = vector.shape_cast %16 : vector<1x2xf32> to vector<1x2xf32>
    %18 = vector.broadcast %17 : vector<1x2xf32> to vector<2x2xf32>
    %19 = arith.mulf %15, %18 : vector<2x2xf32>
    %20 = arith.addf %12, %19 : vector<2x2xf32>
    %c0_3 = arith.constant 0 : index
    %c0_4 = arith.constant 0 : index
    %21 = vector.load %arg2[%c0_3, %c0_4] : memref<2x2xf32, #tpu.memory_space<vmem>>, vector<2x2xf32>
    tpu.vector_store %arg2[%c0_3, %c0_4], %20 {strides = array<i32>} : memref<2x2xf32, #tpu.memory_space<vmem>>, vector<2x2xf32>,
    return
  }
}

</mosaic_0001>

<bundles_post_ra>
// kernel: tpu_custom_call.1
= control target key start
LH: loop header
LB: loop body
LE: loop exit
PB: predicated region body
PF: predicated region fallthrough
CT: control target
= control target key end

     0   :  { %7 = vsyncpa [#allocation3], 0  ;;  %s187_s0 = inlined_call_operand.hbm [shape: f32[2,2], index: 0, kind: input, shape index: {}]   ;;  %s188_s1 = inlined_call_operand.hbm [shape: f32[2,3], index: 1, kind: input, shape index: {}]   ;;  %s189_s2 = inlined_call_operand.hbm [shape: f32[2,2], index: 2, kind: output, shape index: {}]  }
   0x1   :  { %8 = vsyncpa [#allocation6], 0 }
   0x2   :  { %9 = vsyncpa [#allocation4], 0  ;;  %s157_s9 = smov [#allocation2]   ;;  %s158_s11 = smov [#allocation5]  }
   0x3   :  { %s16_s10 = sshll.u32 %s157_s9, 4  ;;  %s26_s12 = sshll.u32 %s158_s11, 4  ;;  %s17_s10 = int_to_ptr.vmem [resolvable:$true] %s16_s10  ;;  %s27_s12 = int_to_ptr.vmem [resolvable:$true] %s26_s12 }
   0x4   :  { %s99_s13 = scalar_lea.vmem %s17_s10, 32  ;;  %p104_p1 = scmp.lt.s32.totalorder %s17_s10, %s17_s10 }
   0x5   :  { %p100_p0 = scmp.ne.s32.totalorder %s17_s10, %s99_s13  ;;  %p105_p2 = scmp.lt.s32.totalorder %s99_s13, %s99_s13 }
   0x7   :  { %p106_p3 = por %p105_p2, %p104_p1 }
   0x9   :  { %p107_p4 = pnand %p106_p3, %p100_p0 }
   0xb   :  { %110 = shalt.err (!%p107_p4)
}
   0xc   :  { %19 = dma.hbm_to_vmem [thread:$0]  %s187_s0, 32, %s17_s10, [#allocation3]  }
   0xd   :  { %s119_s16 = scalar_lea.vmem %s27_s12, 32  ;;  %p124_p6 = scmp.lt.s32.totalorder %s27_s12, %s27_s12 }
   0xe   :  { %p120_p5 = scmp.ne.s32.totalorder %s27_s12, %s119_s16  ;;  %p125_p7 = scmp.lt.s32.totalorder %s119_s16, %s119_s16 }
  0x10   :  { %p126_p8 = por %p125_p7, %p124_p6 }
  0x12   :  { %p127_p9 = pnand %p126_p8, %p120_p5 }
  0x14   :  { %130 = shalt.err (!%p127_p9)
}
  0x15   :  { %29 = dma.hbm_to_vmem [thread:$0]  %s188_s1, 32, %s27_s12, [#allocation6]  }
  0x16   :  { %151 = dma.done.wait [#allocation3], 32  }
  0x17   :  { %152 = vsyncadd [#allocation3], 4294967264 }
  0x18   :  { %153 = dma.done.wait [#allocation6], 32  }
  0x19   :  { %154 = vsyncadd [#allocation6], 4294967264  ;;  %v159_v0 = vmov 0   ;;  %v160_v1 = vmov 1   ;;  %v37_v2 = vld [vmem:[#allocation5] sm:$0x3]  ;;  %v47_v4 = vlaneseq }
  0x1a   :  { %87 = vset.pattern.permute.xlu0 %v159_v0  ;;  %89 = vset.pattern.permute.xlu1 %v160_v1  ;;  %v161_v3 = vmov 2   ;;  %v36_v8 = vld [vmem:[#allocation2] sm:$0x3]  ;;  %s162_s0 = smov [#allocation7]   ;;  %vm63_vm0 = vcmask 9216  }
  0x1b   :  { %44 = vperm.xlu0 %87, %v37_v2   ;;  %54 = vperm.xlu1 %89, %v37_v2   ;;  %v48_v5 = vshrl.u32 %v47_v4, 7  ;;  %s71_s1 = sshll.u32 %s162_s0, 4  ;;  %s72_s1 = int_to_ptr.vmem [resolvable:$true] %s71_s1 }
  0x1c   :  { %s131_s19 = scalar_lea.vmem %s72_s1, 32  ;;  %p136_p11 = scmp.lt.s32.totalorder %s72_s1, %s72_s1 }
  0x1d   :  { %v49_v6 = vsub.s32 0, %v48_v5  ;;  %v59_v7 = vsub.s32 1, %v48_v5  ;;  %p132_p10 = scmp.ne.s32.totalorder %s72_s1, %s131_s19  ;;  %p137_p12 = scmp.lt.s32.totalorder %s131_s19, %s131_s19 }
  0x1f   :  { %88 = vset.pattern.permute.xlu0 %v161_v3  ;;  %v50_v10 = vrot.slane %v36_v8, %v49_v6  ;;  %v60_v11 = vrot.slane %v36_v8, %v59_v7  ;;  %p138_p13 = por %p137_p12, %p136_p11 }
  0x20   :  { %40 = vperm.xlu0 %88, %v37_v2  }
  0x21   :  { %p139_p0 = pnand %p138_p13, %p132_p10 }
  0x24   :  { %90 = vset.pattern.permute.xlu0 %v160_v1 }
  0x96   :  { %v45_v9 = vpop.permute.xlu0 %44  ;;  %v55_v12 = vpop.permute.xlu1 %54 }
  0x97   :  { %v51_v13 = vmul.f32 %v50_v10, %v45_v9  ;;  %v61_v14 = vmul.f32 %v60_v11, %v55_v12 }
  0x9b   :  { %v41_v15 = vpop.permute.xlu0 %40 }
  0x9c   :  { %v52_v16 = vadd.f32 %v51_v13, %v41_v15 }
  0x9e   :  { %v62_v17 = vadd.f32 %v61_v14, %v52_v16 }
  0xa0   :  { %64 = vst.msk [vmem:[#allocation7] sm:$0x3] %vm63_vm0, %v62_v17 }
  0xa1   :  { %142 = shalt.err (!%p139_p0)
}
  0xa2   :  { %74 = dma.vmem_to_hbm [thread:$0]  %s72_s1, 32, %s189_s2, [#allocation4]  }
  0xa3   :  { %155 = dma.done.wait [#allocation4], 32  }
  0xa4   :  { %156 = vsyncadd [#allocation4], 4294967264 }
  0xa5   :  { %78 = vsyncpa [#allocation3], 1 }
  0xa6   :  { %79 = vsyncpa [#allocation6], 1 }
  0xa7   :  { %80 = vsyncpa [#allocation4], 1 }

</bundles_post_ra>
